<compile_context>
chip_gen: v6e
topology: v6e:2x2x1
jax: 0.10.0
libtpu: 0.0.40
codegen_flags: <defaults>
</compile_context>

<pallas_src>
import numpy as np
import jax
import jax.numpy as jnp
from jax.experimental import pallas as pl
from jax.experimental.pallas import tpu as pltpu

EPSILON = 1e-8
LANE = 128
TARGET_BLOCK_BYTES = 2 * 1024 * 1024  # ~2 MiB f32 per (row_tile, lane) block


def _segment_matrix(d):
    """(128,128) f32 block-diagonal ones: S[i,j] = 1 iff i//d == j//d."""
    i = np.arange(LANE)
    return jnp.asarray((i[:, None] // d) == (i[None, :] // d), dtype=jnp.float32)


def _pick_row_tile(rows, lane_width, target_bytes=TARGET_BLOCK_BYTES):
    """Rows per block so one f32 block is ~target_bytes (amortises per-step overhead)."""
    per_row = lane_width * 4
    t = max(8, target_bytes // per_row)
    if t >= rows:
        return rows                    # one block covering the full extent
    return max(8, (t // 8) * 8)        # otherwise must be a multiple of 8 (sublanes)


def _squash_packed_kernel(x_ref, seg_ref, o_ref):
    # x_ref/o_ref: (row_tile, 128) with k = 128 // D capsules packed per lane-dense row.
    x = x_ref[...].astype(jnp.float32)
    xx = x * x
    # Segmented sum-of-squares + broadcast back across each D-wide segment in one MXU op.
    s2 = jnp.dot(xx, seg_ref[...],
                 preferred_element_type=jnp.float32,
                 precision=jax.lax.Precision.HIGHEST)
    scale = s2 / (1.0 + s2) * jax.lax.rsqrt(s2 + EPSILON)
    o_ref[...] = (x * scale).astype(o_ref.dtype)


def _squash_kernel(x_ref, o_ref):
    # Fallback path: one capsule per row; lane axis = capsule_dim.
    x = x_ref[...].astype(jnp.float32)
    s2 = jnp.sum(x * x, axis=-1, keepdims=True)
    scale = s2 / (1.0 + s2) * jax.lax.rsqrt(s2 + EPSILON)
    o_ref[...] = (x * scale).astype(o_ref.dtype)


def squash(x, *, target_block_bytes=TARGET_BLOCK_BYTES):
    """Capsule squash along the last axis of x (any leading shape). No parameters."""
    orig_shape = x.shape
    d = orig_shape[-1]
    rows = int(np.prod(orig_shape[:-1])) if len(orig_shape) > 1 else 1
    x2 = x.reshape(rows, d)

    compiler_params = pltpu.CompilerParams(
        dimension_semantics=("parallel",),
        vmem_limit_bytes=32 * 1024 * 1024,
    )

    # Lane-dense packed path: view (rows, d) as (rows // k, 128).
    if 0 < d < LANE and LANE % d == 0:
        k = LANE // d
        if rows >= k and rows % k == 0:
            rp = rows // k
            xp = x2.reshape(rp, LANE)
            row_tile = _pick_row_tile(rp, LANE, target_block_bytes)
            out = pl.pallas_call(
                _squash_packed_kernel,
                out_shape=jax.ShapeDtypeStruct((rp, LANE), x.dtype),
                grid=(pl.cdiv(rp, row_tile),),
                in_specs=[
                    pl.BlockSpec((row_tile, LANE), lambda i: (i, 0)),
                    pl.BlockSpec((LANE, LANE), lambda i: (0, 0)),  # constant, stays resident
                ],
                out_specs=pl.BlockSpec((row_tile, LANE), lambda i: (i, 0)),
                compiler_params=compiler_params,
            )(xp, _segment_matrix(d))
            return out.reshape(orig_shape)

    # Fallback (d >= 128 already lane-dense, d not a divisor of 128, or rows not packable).
    row_tile = _pick_row_tile(rows, d, target_block_bytes)
    out = pl.pallas_call(
        _squash_kernel,
        out_shape=jax.ShapeDtypeStruct((rows, d), x.dtype),
        grid=(pl.cdiv(rows, row_tile),),
        in_specs=[pl.BlockSpec((row_tile, d), lambda i: (i, 0))],
        out_specs=pl.BlockSpec((row_tile, d), lambda i: (i, 0)),
        compiler_params=compiler_params,
    )(x2)
    return out.reshape(orig_shape)


def squash_ref(x):
    x32 = x.astype(jnp.float32)
    s2 = jnp.sum(x32 * x32, axis=-1, keepdims=True)
    return (s2 / (1.0 + s2) * (x32 / jnp.sqrt(s2 + EPSILON))).astype(x.dtype)


if __name__ == "__main__":
    key = jax.random.PRNGKey(0)

    # Primary shape: (batch=2, num_capsules=8, capsule_dim=32) -> packed lane-dense path.
    x = jax.random.normal(key, (2, 8, 32), dtype=jnp.float32)
    out = jax.block_until_ready(squash(x))
    ref = squash_ref(x)
    assert out.shape == x.shape and out.dtype == x.dtype
    assert jnp.allclose(out, ref, atol=1e-5, rtol=1e-5), "packed path mismatch vs reference"

    # Fallback path (capsule_dim == 128 -> already lane-dense).
    x2 = jax.random.normal(jax.random.PRNGKey(1), (2, 4, 128), dtype=jnp.float32)
    out2 = jax.block_until_ready(squash(x2))
    assert jnp.allclose(out2, squash_ref(x2), atol=1e-5, rtol=1e-5), "fallback path mismatch"

    print("KERNEL_OK")
</pallas_src>

<mosaic_0001>
module attributes {stable_mosaic.version = 11 : i64} {
  func.func @_squash_packed_kernel(%arg0: i32, %arg1: memref<4x128xf32, #tpu.memory_space<vmem>>, %arg2: memref<128x128xf32, #tpu.memory_space<vmem>>, %arg3: memref<4x128xf32, #tpu.memory_space<vmem>>) attributes {dimension_semantics = [#tpu.dimension_semantics<parallel>], iteration_bounds = array<i64: 1>, scalar_prefetch = 0 : i64, scratch_operands = 0 : i64, tpu.core_type = #tpu.core_type<tc>, window_params = [{transform_indices = @transform_0, window_bounds = array<i64: 4, 128>}, {pipeline_mode = #tpu.pipeline_mode<synchronous>, transform_indices = @transform_1, window_bounds = array<i64: 128, 128>}, {transform_indices = @transform_2, window_bounds = array<i64: 4, 128>}]} {
    %c0 = arith.constant 0 : index
    %c0_0 = arith.constant 0 : index
    %0 = vector.load %arg1[%c0, %c0_0] : memref<4x128xf32, #tpu.memory_space<vmem>>, vector<4x128xf32>
    %1 = arith.mulf %0, %0 : vector<4x128xf32>
    %c0_1 = arith.constant 0 : index
    %c0_2 = arith.constant 0 : index
    %2 = vector.load %arg2[%c0_1, %c0_2] : memref<128x128xf32, #tpu.memory_space<vmem>>, vector<128x128xf32>
    %cst = arith.constant dense<0.000000e+00> : vector<4x128xf32>
    %3 = tpu.matmul %1, %2, %cst {dimension_numbers = #tpu.dot_dimension_numbers<[1], [0], [0], [1], [0, 0, 1, 1], [], []>, precision = #tpu.contract_precision<fp32>} : vector<4x128xf32>, vector<128x128xf32>, vector<4x128xf32> -> vector<4x128xf32>
    %cst_3 = arith.constant 1.000000e+00 : f32
    %4 = vector.broadcast %cst_3 : f32 to vector<4x128xf32>
    %5 = arith.addf %4, %3 : vector<4x128xf32>
    %6 = arith.divf %3, %5 : vector<4x128xf32>
    %cst_4 = arith.constant 9.99999993E-9 : f32
    %7 = vector.broadcast %cst_4 : f32 to vector<4x128xf32>
    %8 = arith.addf %3, %7 : vector<4x128xf32>
    %9 = math.rsqrt %8 : vector<4x128xf32>
    %10 = arith.mulf %6, %9 : vector<4x128xf32>
    %11 = arith.mulf %0, %10 : vector<4x128xf32>
    %c0_5 = arith.constant 0 : index
    %c0_6 = arith.constant 0 : index
    %12 = vector.load %arg3[%c0_5, %c0_6] : memref<4x128xf32, #tpu.memory_space<vmem>>, vector<4x128xf32>
    tpu.vector_store %arg3[%c0_5, %c0_6], %11 {strides = array<i32>} : memref<4x128xf32, #tpu.memory_space<vmem>>, vector<4x128xf32>,
    return
  }
  func.func @transform_0(%arg0: i32) -> (i32, i32) {
    %c0_i32 = arith.constant 0 : i32
    %c0_i32_0 = arith.constant 0 : i32
    return %arg0, %c0_i32 : i32, i32
  }
  func.func @transform_1(%arg0: i32) -> (i32, i32) {
    %c0_i32 = arith.constant 0 : i32
    %c0_i32_0 = arith.constant 0 : i32
    %c0_i32_1 = arith.constant 0 : i32
    return %c0_i32, %c0_i32_0 : i32, i32
  }
  func.func @transform_2(%arg0: i32) -> (i32, i32) {
    %c0_i32 = arith.constant 0 : i32
    %c0_i32_0 = arith.constant 0 : i32
    return %arg0, %c0_i32 : i32, i32
  }
}

</mosaic_0001>

<bundles_post_ra>
// kernel: tpu_custom_call.1
= control target key start
LH: loop header
LB: loop body
LE: loop exit
PB: predicated region body
PF: predicated region fallthrough
CT: control target
= control target key end

     0   :  { %7 = vsyncpa [#allocation3], 0  ;;  %s1509_s0 = inlined_call_operand.hbm [shape: f32[4,128], index: 0, kind: input, shape index: {}]   ;;  %s1510_s1 = inlined_call_operand.hbm [shape: f32[128,128], index: 1, kind: input, shape index: {}]   ;;  %s1511_s2 = inlined_call_operand.hbm [shape: f32[4,128], index: 2, kind: output, shape index: {}]  }
   0x1   :  { %8 = vsyncpa [#allocation6], 0 }
   0x2   :  { %9 = vsyncpa [#allocation4], 0  ;;  %s1110_s9 = smov [#allocation2]   ;;  %s1111_s11 = smov [#allocation5]  }
   0x3   :  { %s16_s10 = sshll.u32 %s1110_s9, 4  ;;  %s25_s12 = sshll.u32 %s1111_s11, 4  ;;  %s17_s10 = int_to_ptr.vmem [resolvable:$true] %s16_s10  ;;  %s26_s12 = int_to_ptr.vmem [resolvable:$true] %s25_s12 }
   0x4   :  { %s1052_s13 = scalar_lea.vmem %s17_s10, 64  ;;  %p1057_p1 = scmp.lt.s32.totalorder %s17_s10, %s17_s10 }
   0x5   :  { %p1053_p0 = scmp.ne.s32.totalorder %s17_s10, %s1052_s13  ;;  %p1058_p2 = scmp.lt.s32.totalorder %s1052_s13, %s1052_s13 }
   0x7   :  { %p1059_p3 = por %p1058_p2, %p1057_p1 }
   0x9   :  { %p1060_p4 = pnand %p1059_p3, %p1053_p0 }
   0xb   :  { %1063 = shalt.err (!%p1060_p4)
}
   0xc   :  { %19 = dma.hbm_to_vmem [thread:$0]  %s1509_s0, 64, %s17_s10, [#allocation3]  }
   0xd   :  { %s1072_s16 = scalar_lea.vmem %s26_s12, 2048  ;;  %p1077_p6 = scmp.lt.s32.totalorder %s26_s12, %s26_s12 }
   0xe   :  { %p1073_p5 = scmp.ne.s32.totalorder %s26_s12, %s1072_s16  ;;  %p1078_p7 = scmp.lt.s32.totalorder %s1072_s16, %s1072_s16 }
  0x10   :  { %p1079_p8 = por %p1078_p7, %p1077_p6 }
  0x12   :  { %p1080_p9 = pnand %p1079_p8, %p1073_p5 }
  0x14   :  { %1083 = shalt.err (!%p1080_p9)
}
  0x15   :  { %s1112_s17 = smov 128   ;;  %s1113_s18 = smov 8  }
  0x16   :  { %31 = dma.hbm_to_vmem [thread:$0]  %s1510_s1, 2048, %s26_s12, [#allocation6], %s1112_s17, %s1112_s17, %s1113_s18  }
  0x17   :  { %1104 = dma.done.wait [#allocation3], 64  }
  0x18   :  { %1105 = vsyncadd [#allocation3], 4294967232 }
  0x19   :  { %1106 = dma.done.wait [#allocation6], 2048  }
  0x1a   :  { %1107 = vsyncadd [#allocation6], 4294965248  ;;  %v1114_v0 = vmov 0.0   ;;  %vm1115_vm0 = vmmov 0   ;;  %v55_v1 = vld [vmem:[#allocation5 + $0x78] sm:$0xff]  ;;  %v54_v2 = vld [vmem:[#allocation5 + $0x70] sm:$0xff] }
  0x1b   :  { %823 = vmatprep.subr.mxu0 %v1114_v0  ;;  %858 = vmatprep.subr.mxu1 %v1114_v0  ;;  %v53_v3 = vld [vmem:[#allocation5 + $0x68] sm:$0xff]  ;;  %v1144_v4 = vand.u32 4294901760, %v55_v1  ;;  %v1146_v5 = vand.u32 4294901760, %v54_v2  ;;  %v52_v7 = vld [vmem:[#allocation5 + $0x60] sm:$0xff]  ;;  %v51_v8 = vld [vmem:[#allocation5 + $0x58] sm:$0xff]  ;;  %s1116_s0 = smov [#allocation7]  }
  0x1c   :  { %855 = vmatprep.mubr.msk.f32.mxu0 %vm1115_vm0, %v1114_v0  ;;  %890 = vmatprep.mubr.msk.f32.mxu1 %vm1115_vm0, %v1114_v0  ;;  %v1148_v6 = vand.u32 4294901760, %v53_v3  ;;  %v50_v9 = vld [vmem:[#allocation5 + $0x50] sm:$0xff]  ;;  %v1150_v10 = vand.u32 4294901760, %v52_v7  ;;  %v1152_v11 = vand.u32 4294901760, %v51_v8  ;;  %v49_v13 = vld [vmem:[#allocation5 + $0x48] sm:$0xff]  ;;  %v48_v14 = vld [vmem:[#allocation5 + $0x40] sm:$0xff] }
  0x1d   :  { %v1154_v12 = vand.u32 4294901760, %v50_v9  ;;  %824 = vmatpush3.msra.mxu0 %v1144_v4  ;;  %v1158_v15 = vsub.f32 %v55_v1, %v1144_v4  ;;  %v1161_v16 = vsub.f32 %v54_v2, %v1146_v5  ;;  %v1163_v17 = vand.u32 4294901760, %v49_v13  ;;  %v47_v19 = vld [vmem:[#allocation5 + $0x38] sm:$0xff]  ;;  %v46_v26 = vld [vmem:[#allocation5 + $0x30] sm:$0xff]  ;;  %v45_v34 = vld [vmem:[#allocation5 + $0x28] sm:$0xff]  ;;  %s711_s1 = sshll.u32 %s1116_s0, 4  ;;  %s712_s1 = int_to_ptr.vmem [resolvable:$true] %s711_s1 }
  0x1e   :  { %v1166_v18 = vsub.f32 %v53_v3, %v1148_v6  ;;  %825 = vmatprep.subr.mxu0 %v1114_v0  ;;  %v1170_v20 = vsub.f32 %v52_v7, %v1150_v10  ;;  %v1173_v21 = vsub.f32 %v51_v8, %v1152_v11  ;;  %v1179_v25 = vand.u32 4294901760, %v48_v14  ;;  %v44_v41 = vld [vmem:[#allocation5 + $0x20] sm:$0xff]  ;;  %v1224_v48 = vld [vmem:[#allocation2] sm:$0xf]  ;;  %v42_v54 = vld [vmem:[#allocation5 + $0x10] sm:$0xff]  ;;  %s1084_s21 = scalar_lea.vmem %s712_s1, 64  ;;  %p1089_p11 = scmp.lt.s32.totalorder %s712_s1, %s712_s1 }
  0x1f   :  { %826 = vmatpush3.msra.mxu0 %v1146_v5  ;;  %v150_v22 = vand.u32 4294901760, %v1158_v15  ;;  %v157_v23 = vand.u32 4294901760, %v1161_v16  ;;  %v1183_v28 = vand.u32 4294901760, %v47_v19  ;;  %v1187_v30 = vsub.f32 %v50_v9, %v1154_v12  ;;  %v43_v50 = vld [vmem:[#allocation5 + $0x18] sm:$0xff]  ;;  %v41_v61 = vld [vmem:[#allocation5 + $0x8] sm:$0xff]  ;;  %v40_v8 = vld [vmem:[#allocation5] sm:$0xff]  ;;  %p1085_p10 = scmp.ne.s32.totalorder %s712_s1, %s1084_s21  ;;  %p1090_p12 = scmp.lt.s32.totalorder %s1084_s21, %s1084_s21 }
  0x20   :  { %v164_v24 = vand.u32 4294901760, %v1166_v18  ;;  %827 = vmatprep.subr.mxu0 %v1114_v0  ;;  %v171_v27 = vand.u32 4294901760, %v1170_v20  ;;  %v178_v29 = vand.u32 4294901760, %v1173_v21  ;;  %v1200_v35 = vsub.f32 %v49_v13, %v1163_v17 }
  0x21   :  { %828 = vmatpush3.msra.mxu0 %v1148_v6  ;;  %v151_v31 = vsub.f32 %v1158_v15, %v150_v22  ;;  %v158_v32 = vsub.f32 %v1161_v16, %v157_v23  ;;  %v1203_v36 = vand.u32 4294901760, %v46_v26  ;;  %v185_v40 = vand.u32 4294901760, %v1187_v30  ;;  %p1091_p13 = por %p1090_p12, %p1089_p11 }
  0x22   :  { %v165_v33 = vsub.f32 %v1166_v18, %v164_v24  ;;  %829 = vmatprep.subr.mxu0 %v1114_v0  ;;  %v172_v39 = vsub.f32 %v1170_v20, %v171_v27  ;;  %v1211_v42 = vand.u32 4294901760, %v45_v34  ;;  %v1214_v43 = vsub.f32 %v48_v14, %v1179_v25 }
  0x23   :  { %830 = vmatpush3.msra.mxu0 %v1150_v10  ;;  %v152_v37 = vand.u32 4294901760, %v151_v31  ;;  %v159_v38 = vand.u32 4294901760, %v158_v32  ;;  %v179_v45 = vsub.f32 %v1173_v21, %v178_v29  ;;  %v192_v46 = vand.u32 4294901760, %v1200_v35  ;;  %p1092_p0 = pnand %p1091_p13, %p1085_p10 }
  0x24   :  { %831 = vmatprep.subr.mxu0 %v1114_v0  ;;  %v166_v44 = vand.u32 4294901760, %v165_v33  ;;  %v1222_v47 = vsub.f32 %v47_v19, %v1183_v28  ;;  %v1228_v49 = vand.u32 4294901760, %v44_v41  ;;  %v173_v51 = vand.u32 4294901760, %v172_v39 }
  0x25   :  { %832 = vmatpush3.msra.mxu0 %v1152_v11  ;;  %859 = vmatpush3.msra.mxu1 %v152_v37  ;;  %v186_v52 = vsub.f32 %v1187_v30, %v185_v40  ;;  %v199_v53 = vand.u32 4294901760, %v1214_v43  ;;  %v1236_v55 = vsub.f32 %v46_v26, %v1203_v36  ;;  %v39_v57 = vmul.f32 %v1224_v48, %v1224_v48 }
  0x26   :  { %833 = vmatprep.subr.mxu0 %v1114_v0  ;;  %860 = vmatprep.subr.mxu1 %v1114_v0  ;;  %v206_v56 = vand.u32 4294901760, %v1222_v47  ;;  %v180_v58 = vand.u32 4294901760, %v179_v45  ;;  %v193_v59 = vsub.f32 %v1200_v35, %v192_v46  ;;  %v1247_v60 = vand.u32 4294901760, %v43_v50 }
  0x27   :  { %834 = vmatpush3.msra.mxu0 %v1154_v12  ;;  %861 = vmatpush3.msra.mxu1 %v159_v38  ;;  %v1250_v62 = vsub.f32 %v45_v34, %v1211_v42  ;;  %v1254_v63 = vand.u32 4294901760, %v42_v54  ;;  %v1256_v1 = vand.u32 4294901760, %v39_v57  ;;  %v187_v2 = vand.u32 4294901760, %v186_v52 }
  0x28   :  { %835 = vmatprep.subr.mxu0 %v1114_v0  ;;  %862 = vmatprep.subr.mxu1 %v1114_v0  ;;  %v200_v3 = vsub.f32 %v1214_v43, %v199_v53  ;;  %v213_v7 = vand.u32 4294901760, %v1236_v55  ;;  %v1264_v9 = vsub.f32 %v44_v41, %v1228_v49  ;;  %v207_v13 = vsub.f32 %v1222_v47, %v206_v56 }
  0x29   :  { %836 = vmatpush3.msra.mxu0 %v1163_v17  ;;  %863 = vmatpush3.msra.mxu1 %v166_v44  ;;  %v1271_v14 = vand.u32 4294901760, %v41_v61  ;;  %v194_v19 = vand.u32 4294901760, %v193_v59  ;;  %v220_v26 = vand.u32 4294901760, %v1250_v62  ;;  %v1276_v31 = vsub.f32 %v39_v57, %v1256_v1 }
  0x2a   :  { %837 = vmatprep.subr.mxu0 %v1114_v0  ;;  %864 = vmatprep.subr.mxu1 %v1114_v0  ;;  %v1279_v32 = vsub.f32 %v43_v50, %v1247_v60  ;;  %v1283_v33 = vand.u32 4294901760, %v40_v8  ;;  %v201_v34 = vand.u32 4294901760, %v200_v3  ;;  %v214_v37 = vsub.f32 %v1236_v55, %v213_v7 }
  0x2b   :  { %838 = vmatpush3.msra.mxu0 %v1179_v25  ;;  %865 = vmatpush3.msra.mxu1 %v173_v51  ;;  %v227_v38 = vand.u32 4294901760, %v1264_v9  ;;  %v1291_v39 = vsub.f32 %v42_v54, %v1254_v63  ;;  %v208_v41 = vand.u32 4294901760, %v207_v13  ;;  %v221_v44 = vsub.f32 %v1250_v62, %v220_v26 }
  0x2c   :  { %839 = vmatprep.subr.mxu0 %v1114_v0  ;;  %866 = vmatprep.subr.mxu1 %v1114_v0  ;;  %v139_v45 = vand.u32 4294901760, %v1276_v31  ;;  %v234_v50 = vand.u32 4294901760, %v1279_v32  ;;  %v1302_v51 = vsub.f32 %v41_v61, %v1271_v14  ;;  %v215_v52 = vand.u32 4294901760, %v214_v37 }
  0x2d   :  { %840 = vmatpush3.msra.mxu0 %v1183_v28  ;;  %867 = vmatpush3.msra.mxu1 %v180_v58  ;;  %v228_v54 = vsub.f32 %v1264_v9, %v227_v38  ;;  %v241_v57 = vand.u32 4294901760, %v1291_v39  ;;  %v1312_v58 = vsub.f32 %v40_v8, %v1283_v33  ;;  %v222_v59 = vand.u32 4294901760, %v221_v44 }
  0x2e   :  { %841 = vmatprep.subr.mxu0 %v1114_v0  ;;  %868 = vmatprep.subr.mxu1 %v1114_v0  ;;  %v140_v61 = vsub.f32 %v1276_v31, %v139_v45  ;;  %v248_v3 = vand.u32 4294901760, %v1302_v51 }
  0x2f   :  { %842 = vmatpush3.msra.mxu0 %v1203_v36  ;;  %869 = vmatpush3.msra.mxu1 %v187_v2  ;;  %v235_v2 = vsub.f32 %v1279_v32, %v234_v50  ;;  %v229_v8 = vand.u32 4294901760, %v228_v54  ;;  %v242_v13 = vsub.f32 %v1291_v39, %v241_v57 }
  0x30   :  { %843 = vmatprep.subr.mxu0 %v1114_v0  ;;  %870 = vmatprep.subr.mxu1 %v1114_v0 }
  0x31   :  { %844 = vmatpush3.msra.mxu0 %v1211_v42  ;;  %871 = vmatpush3.msra.mxu1 %v194_v19  ;;  %v255_v19 = vand.u32 4294901760, %v1312_v58  ;;  %v236_v37 = vand.u32 4294901760, %v235_v2  ;;  %v243_v44 = vand.u32 4294901760, %v242_v13 }
  0x32   :  { %845 = vmatprep.subr.mxu0 %v1114_v0  ;;  %872 = vmatprep.subr.mxu1 %v1114_v0 }
  0x33   :  { %846 = vmatpush3.msra.mxu0 %v1228_v49  ;;  %873 = vmatpush3.msra.mxu1 %v201_v34  ;;  %v141_v34 = vand.u32 4294901760, %v140_v61 }
  0x34   :  { %847 = vmatprep.subr.mxu0 %v1114_v0  ;;  %874 = vmatprep.subr.mxu1 %v1114_v0 }
  0x35   :  { %848 = vmatpush3.msra.mxu0 %v1247_v60  ;;  %875 = vmatpush3.msra.mxu1 %v208_v41  ;;  %v249_v41 = vsub.f32 %v1302_v51, %v248_v3 }
  0x36   :  { %849 = vmatprep.subr.mxu0 %v1114_v0  ;;  %876 = vmatprep.subr.mxu1 %v1114_v0 }
  0x37   :  { %850 = vmatpush3.msra.mxu0 %v1254_v63  ;;  %877 = vmatpush3.msra.mxu1 %v215_v52  ;;  %v256_v52 = vsub.f32 %v1312_v58, %v255_v19  ;;  %v250_v54 = vand.u32 4294901760, %v249_v41 }
  0x38   :  { %851 = vmatprep.subr.mxu0 %v1114_v0  ;;  %878 = vmatprep.subr.mxu1 %v1114_v0 }
  0x39   :  { %852 = vmatpush3.msra.mxu0 %v1271_v14  ;;  %879 = vmatpush3.msra.mxu1 %v222_v59  ;;  %v257_v59 = vand.u32 4294901760, %v256_v52 }
  0x3a   :  { %853 = vmatprep.subr.mxu0 %v1114_v0  ;;  %880 = vmatprep.subr.mxu1 %v1114_v0 }
  0x3b   :  { %854 = vmatpush3.msra.mxu0 %v1283_v33  ;;  %881 = vmatpush3.msra.mxu1 %v229_v8 }
  0x3c   :  { %882 = vmatprep.subr.mxu1 %v1114_v0  ;;  %893 = vmatprep.subr.mxu0 %v1114_v0 }
  0x3d   :  { %856 = vmatmul.mubr.f32.vlgmr.msra.gmra.mxu0 %v141_v34  ;;  %883 = vmatpush3.msra.mxu1 %v236_v37 }
  0x3e   :  { %894 = vmatpush3.msra.mxu0 %v1158_v15  ;;  %884 = vmatprep.subr.mxu1 %v1114_v0 }
  0x3f   :  { %895 = vmatprep.subr.mxu0 %v1114_v0  ;;  %885 = vmatpush3.msra.mxu1 %v243_v44 }
  0x40   :  { %896 = vmatpush3.msra.mxu0 %v1161_v16  ;;  %886 = vmatprep.subr.mxu1 %v1114_v0 }
  0x41   :  { %897 = vmatprep.subr.mxu0 %v1114_v0  ;;  %887 = vmatpush3.msra.mxu1 %v250_v54 }
  0x42   :  { %898 = vmatpush3.msra.mxu0 %v1166_v18  ;;  %888 = vmatprep.subr.mxu1 %v1114_v0 }
  0x43   :  { %899 = vmatprep.subr.mxu0 %v1114_v0  ;;  %889 = vmatpush3.msra.mxu1 %v257_v59 }
  0x44   :  { %900 = vmatpush3.msra.mxu0 %v1170_v20  ;;  %891 = vmatmul.mubr.f32.vlgmr.msra.gmra.mxu1 %v1256_v1 }
  0x45   :  { %901 = vmatprep.subr.mxu0 %v1114_v0  ;;  %928 = vmatprep.subr.mxu1 %v1114_v0 }
  0x46   :  { %902 = vmatpush3.msra.mxu0 %v1173_v21  ;;  %929 = vmatpush3.msra.mxu1 %v1144_v4 }
  0x47   :  { %903 = vmatprep.subr.mxu0 %v1114_v0  ;;  %930 = vmatprep.subr.mxu1 %v1114_v0 }
  0x48   :  { %904 = vmatpush3.msra.mxu0 %v1187_v30  ;;  %931 = vmatpush3.msra.mxu1 %v1146_v5 }
  0x49   :  { %905 = vmatprep.subr.mxu0 %v1114_v0  ;;  %932 = vmatprep.subr.mxu1 %v1114_v0 }
  0x4a   :  { %906 = vmatpush3.msra.mxu0 %v1200_v35  ;;  %933 = vmatpush3.msra.mxu1 %v1148_v6 }
  0x4b   :  { %907 = vmatprep.subr.mxu0 %v1114_v0  ;;  %934 = vmatprep.subr.mxu1 %v1114_v0 }
  0x4c   :  { %908 = vmatpush3.msra.mxu0 %v1214_v43  ;;  %935 = vmatpush3.msra.mxu1 %v1150_v10 }
  0x4d   :  { %909 = vmatprep.subr.mxu0 %v1114_v0  ;;  %936 = vmatprep.subr.mxu1 %v1114_v0 }
  0x4e   :  { %910 = vmatpush3.msra.mxu0 %v1222_v47  ;;  %937 = vmatpush3.msra.mxu1 %v1152_v11 }
  0x4f   :  { %911 = vmatprep.subr.mxu0 %v1114_v0  ;;  %938 = vmatprep.subr.mxu1 %v1114_v0 }
  0x50   :  { %912 = vmatpush3.msra.mxu0 %v1236_v55  ;;  %939 = vmatpush3.msra.mxu1 %v1154_v12 }
  0x51   :  { %913 = vmatprep.subr.mxu0 %v1114_v0  ;;  %940 = vmatprep.subr.mxu1 %v1114_v0 }
  0x52   :  { %914 = vmatpush3.msra.mxu0 %v1250_v62  ;;  %941 = vmatpush3.msra.mxu1 %v1163_v17 }
  0x53   :  { %915 = vmatprep.subr.mxu0 %v1114_v0  ;;  %942 = vmatprep.subr.mxu1 %v1114_v0 }
  0x54   :  { %916 = vmatpush3.msra.mxu0 %v1264_v9  ;;  %943 = vmatpush3.msra.mxu1 %v1179_v25 }
  0x55   :  { %917 = vmatprep.subr.mxu0 %v1114_v0  ;;  %944 = vmatprep.subr.mxu1 %v1114_v0 }
  0x56   :  { %918 = vmatpush3.msra.mxu0 %v1279_v32  ;;  %945 = vmatpush3.msra.mxu1 %v1183_v28 }
  0x57   :  { %919 = vmatprep.subr.mxu0 %v1114_v0  ;;  %946 = vmatprep.subr.mxu1 %v1114_v0 }
  0x58   :  { %920 = vmatpush3.msra.mxu0 %v1291_v39  ;;  %947 = vmatpush3.msra.mxu1 %v1203_v36 }
  0x59   :  { %921 = vmatprep.subr.mxu0 %v1114_v0  ;;  %948 = vmatprep.subr.mxu1 %v1114_v0 }
  0x5a   :  { %922 = vmatpush3.msra.mxu0 %v1302_v51  ;;  %949 = vmatpush3.msra.mxu1 %v1211_v42 }
  0x5b   :  { %923 = vmatprep.subr.mxu0 %v1114_v0  ;;  %950 = vmatprep.subr.mxu1 %v1114_v0 }
  0x5c   :  { %924 = vmatpush3.msra.mxu0 %v1312_v58  ;;  %925 = vmatprep.mubr.msk.f32.mxu0 %vm1115_vm0, %v1114_v0 }
  0x5d   :  { %951 = vmatpush3.msra.mxu1 %v1228_v49  ;;  %926 = vmatmul.mubr.f32.vlgmr.msra.gmra.mxu0 %v1276_v31 }
  0x5e   :  { %952 = vmatprep.subr.mxu1 %v1114_v0  ;;  %963 = vmatprep.subr.mxu0 %v1114_v0 }
  0x5f   :  { %953 = vmatpush3.msra.mxu1 %v1247_v60  ;;  %964 = vmatpush3.msra.mxu0 %v150_v22 }
  0x60   :  { %954 = vmatprep.subr.mxu1 %v1114_v0  ;;  %965 = vmatprep.subr.mxu0 %v1114_v0 }
  0x61   :  { %955 = vmatpush3.msra.mxu1 %v1254_v63  ;;  %966 = vmatpush3.msra.mxu0 %v157_v23 }
  0x62   :  { %956 = vmatprep.subr.mxu1 %v1114_v0  ;;  %967 = vmatprep.subr.mxu0 %v1114_v0 }
  0x63   :  { %957 = vmatpush3.msra.mxu1 %v1271_v14  ;;  %968 = vmatpush3.msra.mxu0 %v164_v24 }
  0x64   :  { %958 = vmatprep.subr.mxu1 %v1114_v0  ;;  %969 = vmatprep.subr.mxu0 %v1114_v0 }
  0x65   :  { %959 = vmatpush3.msra.mxu1 %v1283_v33  ;;  %960 = vmatprep.mubr.msk.f32.mxu1 %vm1115_vm0, %v1114_v0 }
  0x66   :  { %970 = vmatpush3.msra.mxu0 %v171_v27  ;;  %961 = vmatmul.mubr.f32.vlgmr.msra.gmra.mxu1 %v139_v45 }
  0x67   :  { %971 = vmatprep.subr.mxu0 %v1114_v0  ;;  %998 = vmatprep.subr.mxu1 %v1114_v0 }
  0x68   :  { %972 = vmatpush3.msra.mxu0 %v178_v29  ;;  %999 = vmatpush3.msra.mxu1 %v1144_v4 }
  0x69   :  { %973 = vmatprep.subr.mxu0 %v1114_v0  ;;  %1000 = vmatprep.subr.mxu1 %v1114_v0 }
  0x6a   :  { %974 = vmatpush3.msra.mxu0 %v185_v40  ;;  %1001 = vmatpush3.msra.mxu1 %v1146_v5 }
  0x6b   :  { %975 = vmatprep.subr.mxu0 %v1114_v0  ;;  %1002 = vmatprep.subr.mxu1 %v1114_v0 }
  0x6c   :  { %976 = vmatpush3.msra.mxu0 %v192_v46  ;;  %1003 = vmatpush3.msra.mxu1 %v1148_v6 }
  0x6d   :  { %977 = vmatprep.subr.mxu0 %v1114_v0  ;;  %1004 = vmatprep.subr.mxu1 %v1114_v0 }
  0x6e   :  { %978 = vmatpush3.msra.mxu0 %v199_v53  ;;  %1005 = vmatpush3.msra.mxu1 %v1150_v10 }
  0x6f   :  { %979 = vmatprep.subr.mxu0 %v1114_v0  ;;  %1006 = vmatprep.subr.mxu1 %v1114_v0 }
  0x70   :  { %980 = vmatpush3.msra.mxu0 %v206_v56  ;;  %1007 = vmatpush3.msra.mxu1 %v1152_v11 }
  0x71   :  { %981 = vmatprep.subr.mxu0 %v1114_v0  ;;  %1008 = vmatprep.subr.mxu1 %v1114_v0 }
  0x72   :  { %982 = vmatpush3.msra.mxu0 %v213_v7  ;;  %1009 = vmatpush3.msra.mxu1 %v1154_v12 }
  0x73   :  { %983 = vmatprep.subr.mxu0 %v1114_v0  ;;  %1010 = vmatprep.subr.mxu1 %v1114_v0 }
  0x74   :  { %984 = vmatpush3.msra.mxu0 %v220_v26  ;;  %1011 = vmatpush3.msra.mxu1 %v1163_v17 }
  0x75   :  { %985 = vmatprep.subr.mxu0 %v1114_v0  ;;  %1012 = vmatprep.subr.mxu1 %v1114_v0 }
  0x76   :  { %986 = vmatpush3.msra.mxu0 %v227_v38  ;;  %1013 = vmatpush3.msra.mxu1 %v1179_v25 }
  0x77   :  { %987 = vmatprep.subr.mxu0 %v1114_v0  ;;  %1014 = vmatprep.subr.mxu1 %v1114_v0 }
  0x78   :  { %988 = vmatpush3.msra.mxu0 %v234_v50  ;;  %1015 = vmatpush3.msra.mxu1 %v1183_v28 }
  0x79   :  { %989 = vmatprep.subr.mxu0 %v1114_v0  ;;  %1016 = vmatprep.subr.mxu1 %v1114_v0 }
  0x7a   :  { %990 = vmatpush3.msra.mxu0 %v241_v57  ;;  %1017 = vmatpush3.msra.mxu1 %v1203_v36 }
  0x7b   :  { %991 = vmatprep.subr.mxu0 %v1114_v0  ;;  %1018 = vmatprep.subr.mxu1 %v1114_v0 }
  0x7c   :  { %992 = vmatpush3.msra.mxu0 %v248_v3  ;;  %1019 = vmatpush3.msra.mxu1 %v1211_v42 }
  0x7d   :  { %993 = vmatprep.subr.mxu0 %v1114_v0  ;;  %1020 = vmatprep.subr.mxu1 %v1114_v0 }
  0x7e   :  { %994 = vmatpush3.msra.mxu0 %v255_v19  ;;  %995 = vmatprep.mubr.msk.f32.mxu0 %vm1115_vm0, %v1114_v0 }
  0x7f   :  { %1021 = vmatpush3.msra.mxu1 %v1228_v49  ;;  %996 = vmatmul.mubr.f32.vlgmr.msra.gmra.mxu0 %v1256_v1 }
  0x80   :  { %1022 = vmatprep.subr.mxu1 %v1114_v0  ;;  %1030 = vmatprep.mubr.msk.f32.mxu1 %vm1115_vm0, %v1114_v0 }
  0x81   :  { %1023 = vmatpush3.msra.mxu1 %v1247_v60 }
  0x82   :  { %1024 = vmatprep.subr.mxu1 %v1114_v0 }
  0x83   :  { %1025 = vmatpush3.msra.mxu1 %v1254_v63 }
  0x84   :  { %1026 = vmatprep.subr.mxu1 %v1114_v0 }
  0x85   :  { %1027 = vmatpush3.msra.mxu1 %v1271_v14 }
  0x86   :  { %1028 = vmatprep.subr.mxu1 %v1114_v0 }
  0x87   :  { %1029 = vmatpush3.msra.mxu1 %v1283_v33 }
  0x88   :  { %1031 = vmatmul.mubr.f32.vlgmr.msra.gmra.mxu1 %v1256_v1 }
  0xfd   :  { %v143_v4 = vpop.f32.mrf.mxu0 }
  0xff   :  { %v857_v5 = vpop.f32.mrf.mxu0 }
 0x104   :  { %v294_v6 = vpop.f32.mrf.mxu1 }
 0x105   :  { %v295_v18 = vadd.f32 %v294_v6, %v143_v4 }
 0x106   :  { %v892_v10 = vpop.f32.mrf.mxu1 }
 0x11d   :  { %v398_v11 = vpop.f32.mrf.mxu0 }
 0x11e   :  { %v399_v21 = vadd.f32 %v398_v11, %v295_v18 }
 0x11f   :  { %v927_v12 = vpop.f32.mrf.mxu0 }
 0x126   :  { %v487_v15 = vpop.f32.mrf.mxu1 }
 0x127   :  { %v488_v22 = vadd.f32 %v487_v15, %v399_v21 }
 0x128   :  { %v962_v16 = vpop.f32.mrf.mxu1 }
 0x13f   :  { %v606_v17 = vpop.f32.mrf.mxu0 }
 0x140   :  { %v607_v23 = vadd.f32 %v606_v17, %v488_v22 }
 0x141   :  { %v997_v20 = vpop.f32.mrf.mxu0 }
 0x148   :  { %v693_v24 = vpop.f32.mrf.mxu1 }
 0x149   :  { %v694_v0 = vadd.f32 %v693_v24, %v607_v23 }
 0x14a   :  { %v1032_v25 = vpop.f32.mrf.mxu1 }
 0x14b   :  { %v697_v27 = vadd.f32 1.0, %v694_v0  ;;  %v700_v28 = vadd.f32 1e-08, %v694_v0 }
 0x14d   :  { %1040 = vrcp.f32 %v697_v27 }
 0x14e   :  { %1042 = vrsqrt.f32 %v700_v28 }
 0x15a   :  { %v1041_v29 = vpop.eup %1040 }
 0x15b   :  { %v699_v30 = vmul.f32 %v1041_v29, %v694_v0  ;;  %v1043_v35 = vpop.eup %1042 }
 0x15d   :  { %v702_v36 = vmul.f32 %v1043_v35, %v699_v30 }
 0x15f   :  { %v703_v40 = vmul.f32 %v702_v36, %v1224_v48 }
 0x161   :  { %704 = vst [vmem:[#allocation7] sm:$0xf] %v703_v40 }
 0x162   :  { %1095 = shalt.err (!%p1092_p0)
}
 0x163   :  { %714 = dma.vmem_to_hbm [thread:$0]  %s712_s1, 64, %s1511_s2, [#allocation4]  }
 0x164   :  { %1108 = dma.done.wait [#allocation4], 64  }
 0x165   :  { %1109 = vsyncadd [#allocation4], 4294967232 }
 0x166   :  { %718 = vsyncpa [#allocation3], 1 }
 0x167   :  { %719 = vsyncpa [#allocation6], 1 }
 0x168   :  { %720 = vsyncpa [#allocation4], 1 }

</bundles_post_ra>
